<compile_context>
chip_gen: v7x
topology: tpu7x:2x2x1
jax: 0.10.0
libtpu: 0.0.40
codegen_flags: <defaults>
</compile_context>

<pallas_src>
import functools

import jax
import jax.numpy as jnp
from jax.experimental import pallas as pl
from jax.experimental.pallas import tpu as pltpu

# ---- model dims (match the PyTorch module constants) ----
INPUT_SIZE = 10
OUTPUT_SIZE = 10
LATENT_SIZE = 10
HIDDEN_SIZE = 20
CONDITION_SIZE = 28 * 28  # 784

_PACK_IN = 32    # packed input lanes:  x(10) | eps(10) | pad(12)
_PACK_OUT = 32   # packed output lanes: rex(10) | mu(10) | sigma(10) | pad(2)

_TB_MAX = 2048       # batch-tile cap (c double-buffer ~12.8 MiB f32)
_TB_FLOOR = 256      # don't shrink tiles below this when splitting for megacore
_TARGET_STEPS = 8    # aim for ~8 grid steps so each v7x TC gets several


def _cvae_kernel(
    xe_ref, c_ref,
    enc_w_ref, enc_b_ref,
    musg_w_ref, musg_b_ref,
    d1wz_ref, d1wc_ref, d1_b_ref,
    d2_w_ref, d2_b_ref,
    out_ref,
):
    f32 = jnp.float32
    xe = xe_ref[...]
    x = xe[:, :INPUT_SIZE]
    eps = xe[:, INPUT_SIZE:INPUT_SIZE + LATENT_SIZE]
    c = c_ref[...]

    # ---------------- Encoder ----------------
    h = jnp.dot(x, enc_w_ref[...], preferred_element_type=f32) + enc_b_ref[...]
    h = jnp.maximum(h, 0.0)  # ReLU

    # Fused mu/sigma head: one (H, 2L) matmul instead of two (H, L) matmuls.
    ms = jnp.dot(h, musg_w_ref[...], preferred_element_type=f32) + musg_b_ref[...]
    mu = ms[:, :LATENT_SIZE]
    sigma = ms[:, LATENT_SIZE:2 * LATENT_SIZE]

    # ---------------- Reparameterization ----------------
    z = mu + eps * sigma

    # ---------------- Decoder ----------------
    # cat([z, c], dim=1) @ W1  ==  z @ W_z + c @ W_c   (no in-VMEM concat)
    h2 = (
        jnp.dot(z, d1wz_ref[...], preferred_element_type=f32)
        + jnp.dot(c, d1wc_ref[...], preferred_element_type=f32)
        + d1_b_ref[...]
    )
    h2 = jnp.maximum(h2, 0.0)  # ReLU

    logits = jnp.dot(h2, d2_w_ref[...], preferred_element_type=f32) + d2_b_ref[...]
    s = 1.0 / (1.0 + jnp.exp(-logits))  # sigmoid

    # F.softmax(x) on a 2-D tensor defaults to dim=1 -> softmax over features.
    m = jnp.max(s, axis=-1, keepdims=True)
    e = jnp.exp(s - m)
    probs = e * pl.reciprocal(jnp.sum(e, axis=-1, keepdims=True), approx=False)

    # Single lane-packed store: rex | mu | sigma | zero-pad.
    tb = probs.shape[0]
    pad = jnp.zeros((tb, _PACK_OUT - (OUTPUT_SIZE + 2 * LATENT_SIZE)), f32)
    out_ref[...] = jnp.concatenate([probs, mu, sigma, pad], axis=-1)


def _round_up(v, m):
    return ((v + m - 1) // m) * m


def _pick_batch_tile(B):
    """Batch tile: big enough to amortize per-step overhead, small enough that
    both v7x TensorCores get several grid steps."""
    tb = _round_up(pl.cdiv(B, _TARGET_STEPS), 8)
    tb = max(_TB_FLOOR, tb)
    tb = min(_TB_MAX, tb)
    if tb >= B:
        tb = B  # single block spanning the whole batch (== full dim: OK)
    return tb


@functools.partial(jax.jit, static_argnames=("use_bf16_c",))
def cvae_forward(x, c, eps, params, use_bf16_c=False):
    """Full CVAE forward inside one batch-tiled Pallas kernel.

    x:   (B, INPUT_SIZE)      float32
    c:   (B, CONDITION_SIZE)  float32
    eps: (B, LATENT_SIZE)     float32  (pre-sampled standard normal)
    use_bf16_c: stream the condition tensor (and its decoder weight slab) in
        bfloat16; halves the dominant HBM stream at a small numerics cost.
    """
    B = x.shape[0]
    tb = _pick_batch_tile(B)
    grid = (pl.cdiv(B, tb),)

    # Lane-pack x | eps | pad into one contiguous (B, 32) slab: one DMA stream
    # instead of two narrow 40-byte-row streams.
    xe = jnp.concatenate(
        [x, eps, jnp.zeros((B, _PACK_IN - INPUT_SIZE - LATENT_SIZE), jnp.float32)],
        axis=1,
    )

    if use_bf16_c:
        c_in = c.astype(jnp.bfloat16)
        d1_wc = params["d1_wc"].astype(jnp.bfloat16)
    else:
        c_in = c
        d1_wc = params["d1_wc"]

    weights = (
        params["enc_w"], params["enc_b"],
        params["musg_w"], params["musg_b"],
        params["d1_wz"], d1_wc, params["d1_b"],
        params["d2_w"], params["d2_b"],
    )

    def batch_spec(feat):
        return pl.BlockSpec((tb, feat), lambda i: (i, 0))

    def const_spec(arr):
        # Constant block index => Pallas keeps the weight block resident
        # (no re-DMA across grid steps).
        return pl.BlockSpec(arr.shape, lambda i: (0, 0))

    in_specs = (
        [batch_spec(_PACK_IN), batch_spec(CONDITION_SIZE)]
        + [const_spec(w) for w in weights]
    )

    out = pl.pallas_call(
        _cvae_kernel,
        out_shape=jax.ShapeDtypeStruct((B, _PACK_OUT), jnp.float32),
        grid=grid,
        in_specs=in_specs,
        out_specs=pl.BlockSpec((tb, _PACK_OUT), lambda i: (i, 0)),
        compiler_params=pltpu.CompilerParams(
            dimension_semantics=("parallel",),    # shard batch across TCs on v7x
            vmem_limit_bytes=40 * 1024 * 1024,    # fits TB=2048 f32 c double-buffer
        ),
    )(xe, c_in, *weights)

    re_x = out[:, :OUTPUT_SIZE]
    mu = out[:, OUTPUT_SIZE:OUTPUT_SIZE + LATENT_SIZE]
    sigma = out[:, OUTPUT_SIZE + LATENT_SIZE:OUTPUT_SIZE + 2 * LATENT_SIZE]
    return re_x, mu, sigma


def init_params(key):
    """Deterministic init mimicking nn.Linear: U(-1/sqrt(fan_in), 1/sqrt(fan_in)).

    Weights stored as (in_features, out_features); mu/sigma heads fused."""
    def linear(k, fan_in, fan_out):
        kw, kb = jax.random.split(k)
        bound = 1.0 / jnp.sqrt(jnp.float32(fan_in))
        w = jax.random.uniform(kw, (fan_in, fan_out), jnp.float32, -bound, bound)
        b = jax.random.uniform(kb, (1, fan_out), jnp.float32, -bound, bound)
        return w, b

    ks = jax.random.split(key, 5)
    enc_w, enc_b = linear(ks[0], INPUT_SIZE, HIDDEN_SIZE)
    mu_w, mu_b = linear(ks[1], HIDDEN_SIZE, LATENT_SIZE)
    sg_w, sg_b = linear(ks[2], HIDDEN_SIZE, LATENT_SIZE)
    # Decoder linear1 acts on cat([z, c]) with fan_in = LATENT + CONDITION.
    d1_w, d1_b = linear(ks[3], LATENT_SIZE + CONDITION_SIZE, HIDDEN_SIZE)
    d2_w, d2_b = linear(ks[4], HIDDEN_SIZE, OUTPUT_SIZE)

    return {
        "enc_w": enc_w, "enc_b": enc_b,
        # fused mu/sigma head: single (HIDDEN, 2*LATENT) matmul in the kernel
        "musg_w": jnp.concatenate([mu_w, sg_w], axis=1),
        "musg_b": jnp.concatenate([mu_b, sg_b], axis=1),
        # split decoder linear1 weight so the kernel avoids an in-VMEM concat
        "d1_wz": d1_w[:LATENT_SIZE, :],
        "d1_wc": d1_w[LATENT_SIZE:, :],
        "d1_b": d1_b,
        "d2_w": d2_w, "d2_b": d2_b,
    }


def reference_forward(x, c, eps, params):
    """Pure-JAX reference mirroring the PyTorch module semantics (f32)."""
    h = jax.nn.relu(x @ params["enc_w"] + params["enc_b"])
    ms = h @ params["musg_w"] + params["musg_b"]
    mu = ms[:, :LATENT_SIZE]
    sigma = ms[:, LATENT_SIZE:]
    z = mu + eps * sigma
    zc = jnp.concatenate([z, c], axis=1)
    d1_w = jnp.concatenate([params["d1_wz"], params["d1_wc"]], axis=0)
    h2 = jax.nn.relu(zc @ d1_w + params["d1_b"])
    s = jax.nn.sigmoid(h2 @ params["d2_w"] + params["d2_b"])
    re_x = jax.nn.softmax(s, axis=1)
    return re_x, mu, sigma


if __name__ == "__main__":
    key = jax.random.PRNGKey(0)
    k_params, k_x, k_c, k_eps = jax.random.split(key, 4)
    params = init_params(k_params)

    def run_and_check(B, use_bf16_c=False, atol=1e-5, rtol=1e-5):
        kx, kc, ke = (jax.random.fold_in(k, B) for k in (k_x, k_c, k_eps))
        x = jax.random.normal(kx, (B, INPUT_SIZE), jnp.float32)
        c = jax.random.normal(kc, (B, CONDITION_SIZE), jnp.float32)
        # eps = torch.randn_like(sigma): pre-sample deterministically.
        eps = jax.random.normal(ke, (B, LATENT_SIZE), jnp.float32)

        re_x, mu, sigma = cvae_forward(x, c, eps, params, use_bf16_c=use_bf16_c)
        jax.block_until_ready((re_x, mu, sigma))

        r_re_x, r_mu, r_sigma = reference_forward(x, c, eps, params)
        assert jnp.allclose(re_x, r_re_x, atol=atol, rtol=rtol)
        # mu/sigma do not depend on c -> always tight.
        assert jnp.allclose(mu, r_mu, atol=1e-5, rtol=1e-5)
        assert jnp.allclose(sigma, r_sigma, atol=1e-5, rtol=1e-5)
        assert jnp.allclose(jnp.sum(re_x, axis=1), 1.0, atol=1e-4)

    # small shape consistent with the module (single block, tb == B)
    run_and_check(2)
    # partial last tile (grid=2, last block masked on writeback)
    run_and_check(300)
    # multi-tile path: 4 grid steps of tb=256 -> both v7x TCs, pipelined c stream
    run_and_check(1024)
    # larger batch: 8 grid steps of tb=512
    run_and_check(4096)
    # optional bf16 condition stream (halves dominant HBM traffic); looser tol on re_x
    run_and_check(1024, use_bf16_c=True, atol=5e-2, rtol=5e-2)

    print("KERNEL_OK")
</pallas_src>

<mosaic_0001>
module attributes {stable_mosaic.version = 11 : i64} {
  func.func @_cvae_kernel(%arg0: i32, %arg1: memref<2x32xf32, #tpu.memory_space<vmem>>, %arg2: memref<2x784xf32, #tpu.memory_space<vmem>>, %arg3: memref<10x20xf32, #tpu.memory_space<vmem>>, %arg4: memref<1x20xf32, #tpu.memory_space<vmem>>, %arg5: memref<20x20xf32, #tpu.memory_space<vmem>>, %arg6: memref<1x20xf32, #tpu.memory_space<vmem>>, %arg7: memref<10x20xf32, #tpu.memory_space<vmem>>, %arg8: memref<784x20xf32, #tpu.memory_space<vmem>>, %arg9: memref<1x20xf32, #tpu.memory_space<vmem>>, %arg10: memref<20x10xf32, #tpu.memory_space<vmem>>, %arg11: memref<1x10xf32, #tpu.memory_space<vmem>>, %arg12: memref<2x32xf32, #tpu.memory_space<vmem>>) attributes {dimension_semantics = [#tpu.dimension_semantics<parallel>], iteration_bounds = array<i64: 1>, scalar_prefetch = 0 : i64, scratch_operands = 0 : i64, tpu.core_type = #tpu.core_type<tc>, window_params = [{transform_indices = @transform_0, window_bounds = array<i64: 2, 32>}, {transform_indices = @transform_1, window_bounds = array<i64: 2, 784>}, {pipeline_mode = #tpu.pipeline_mode<synchronous>, transform_indices = @transform_2, window_bounds = array<i64: 10, 20>}, {pipeline_mode = #tpu.pipeline_mode<synchronous>, transform_indices = @transform_3, window_bounds = array<i64: 1, 20>}, {pipeline_mode = #tpu.pipeline_mode<synchronous>, transform_indices = @transform_4, window_bounds = array<i64: 20, 20>}, {pipeline_mode = #tpu.pipeline_mode<synchronous>, transform_indices = @transform_5, window_bounds = array<i64: 1, 20>}, {pipeline_mode = #tpu.pipeline_mode<synchronous>, transform_indices = @transform_6, window_bounds = array<i64: 10, 20>}, {pipeline_mode = #tpu.pipeline_mode<synchronous>, transform_indices = @transform_7, window_bounds = array<i64: 784, 20>}, {pipeline_mode = #tpu.pipeline_mode<synchronous>, transform_indices = @transform_8, window_bounds = array<i64: 1, 20>}, {pipeline_mode = #tpu.pipeline_mode<synchronous>, transform_indices = @transform_9, window_bounds = array<i64: 20, 10>}, {pipeline_mode = #tpu.pipeline_mode<synchronous>, transform_indices = @transform_10, window_bounds = array<i64: 1, 10>}, {transform_indices = @transform_11, window_bounds = array<i64: 2, 32>}]} {
    %c0 = arith.constant 0 : index
    %c0_0 = arith.constant 0 : index
    %0 = vector.load %arg1[%c0, %c0_0] : memref<2x32xf32, #tpu.memory_space<vmem>>, vector<2x32xf32>
    %1 = vector.extract_strided_slice %0 {offsets = [0, 0], sizes = [2, 10], strides = [1, 1]} : vector<2x32xf32> to vector<2x10xf32>
    %2 = vector.extract_strided_slice %0 {offsets = [0, 10], sizes = [2, 10], strides = [1, 1]} : vector<2x32xf32> to vector<2x10xf32>
    %c0_1 = arith.constant 0 : index
    %c0_2 = arith.constant 0 : index
    %3 = vector.load %arg2[%c0_1, %c0_2] : memref<2x784xf32, #tpu.memory_space<vmem>>, vector<2x784xf32>
    %c0_3 = arith.constant 0 : index
    %c0_4 = arith.constant 0 : index
    %4 = vector.load %arg3[%c0_3, %c0_4] : memref<10x20xf32, #tpu.memory_space<vmem>>, vector<10x20xf32>
    %cst = arith.constant dense<0.000000e+00> : vector<2x20xf32>
    %5 = tpu.matmul %1, %4, %cst {dimension_numbers = #tpu.dot_dimension_numbers<[1], [0], [0], [1], [0, 0, 1, 1], [], []>} : vector<2x10xf32>, vector<10x20xf32>, vector<2x20xf32> -> vector<2x20xf32>
    %c0_5 = arith.constant 0 : index
    %c0_6 = arith.constant 0 : index
    %6 = vector.load %arg4[%c0_5, %c0_6] : memref<1x20xf32, #tpu.memory_space<vmem>>, vector<1x20xf32>
    %7 = vector.broadcast %6 : vector<1x20xf32> to vector<2x20xf32>
    %8 = arith.addf %5, %7 : vector<2x20xf32>
    %cst_7 = arith.constant 0.000000e+00 : f32
    %9 = vector.broadcast %cst_7 : f32 to vector<2x20xf32>
    %10 = arith.maximumf %8, %9 : vector<2x20xf32>
    %c0_8 = arith.constant 0 : index
    %c0_9 = arith.constant 0 : index
    %11 = vector.load %arg5[%c0_8, %c0_9] : memref<20x20xf32, #tpu.memory_space<vmem>>, vector<20x20xf32>
    %cst_10 = arith.constant dense<0.000000e+00> : vector<2x20xf32>
    %12 = tpu.matmul %10, %11, %cst_10 {dimension_numbers = #tpu.dot_dimension_numbers<[1], [0], [0], [1], [0, 0, 1, 1], [], []>} : vector<2x20xf32>, vector<20x20xf32>, vector<2x20xf32> -> vector<2x20xf32>
    %c0_11 = arith.constant 0 : index
    %c0_12 = arith.constant 0 : index
    %13 = vector.load %arg6[%c0_11, %c0_12] : memref<1x20xf32, #tpu.memory_space<vmem>>, vector<1x20xf32>
    %14 = vector.broadcast %13 : vector<1x20xf32> to vector<2x20xf32>
    %15 = arith.addf %12, %14 : vector<2x20xf32>
    %16 = vector.extract_strided_slice %15 {offsets = [0, 0], sizes = [2, 10], strides = [1, 1]} : vector<2x20xf32> to vector<2x10xf32>
    %17 = vector.extract_strided_slice %15 {offsets = [0, 10], sizes = [2, 10], strides = [1, 1]} : vector<2x20xf32> to vector<2x10xf32>
    %18 = arith.mulf %2, %17 : vector<2x10xf32>
    %19 = arith.addf %16, %18 : vector<2x10xf32>
    %c0_13 = arith.constant 0 : index
    %c0_14 = arith.constant 0 : index
    %20 = vector.load %arg7[%c0_13, %c0_14] : memref<10x20xf32, #tpu.memory_space<vmem>>, vector<10x20xf32>
    %cst_15 = arith.constant dense<0.000000e+00> : vector<2x20xf32>
    %21 = tpu.matmul %19, %20, %cst_15 {dimension_numbers = #tpu.dot_dimension_numbers<[1], [0], [0], [1], [0, 0, 1, 1], [], []>} : vector<2x10xf32>, vector<10x20xf32>, vector<2x20xf32> -> vector<2x20xf32>
    %c0_16 = arith.constant 0 : index
    %c0_17 = arith.constant 0 : index
    %22 = vector.load %arg8[%c0_16, %c0_17] : memref<784x20xf32, #tpu.memory_space<vmem>>, vector<784x20xf32>
    %cst_18 = arith.constant dense<0.000000e+00> : vector<2x20xf32>
    %23 = tpu.matmul %3, %22, %cst_18 {dimension_numbers = #tpu.dot_dimension_numbers<[1], [0], [0], [1], [0, 0, 1, 1], [], []>} : vector<2x784xf32>, vector<784x20xf32>, vector<2x20xf32> -> vector<2x20xf32>
    %24 = arith.addf %21, %23 : vector<2x20xf32>
    %c0_19 = arith.constant 0 : index
    %c0_20 = arith.constant 0 : index
    %25 = vector.load %arg9[%c0_19, %c0_20] : memref<1x20xf32, #tpu.memory_space<vmem>>, vector<1x20xf32>
    %26 = vector.broadcast %25 : vector<1x20xf32> to vector<2x20xf32>
    %27 = arith.addf %24, %26 : vector<2x20xf32>
    %cst_21 = arith.constant 0.000000e+00 : f32
    %28 = vector.broadcast %cst_21 : f32 to vector<2x20xf32>
    %29 = arith.maximumf %27, %28 : vector<2x20xf32>
    %c0_22 = arith.constant 0 : index
    %c0_23 = arith.constant 0 : index
    %30 = vector.load %arg10[%c0_22, %c0_23] : memref<20x10xf32, #tpu.memory_space<vmem>>, vector<20x10xf32>
    %cst_24 = arith.constant dense<0.000000e+00> : vector<2x10xf32>
    %31 = tpu.matmul %29, %30, %cst_24 {dimension_numbers = #tpu.dot_dimension_numbers<[1], [0], [0], [1], [0, 0, 1, 1], [], []>} : vector<2x20xf32>, vector<20x10xf32>, vector<2x10xf32> -> vector<2x10xf32>
    %c0_25 = arith.constant 0 : index
    %c0_26 = arith.constant 0 : index
    %32 = vector.load %arg11[%c0_25, %c0_26] : memref<1x10xf32, #tpu.memory_space<vmem>>, vector<1x10xf32>
    %33 = vector.broadcast %32 : vector<1x10xf32> to vector<2x10xf32>
    %34 = arith.addf %31, %33 : vector<2x10xf32>
    %cst_27 = arith.constant 0.000000e+00 : f32
    %35 = vector.broadcast %cst_27 : f32 to vector<2x10xf32>
    %36 = arith.subf %35, %34 : vector<2x10xf32>
    %37 = math.exp %36 : vector<2x10xf32>
    %cst_28 = arith.constant 1.000000e+00 : f32
    %38 = vector.broadcast %cst_28 : f32 to vector<2x10xf32>
    %39 = arith.addf %38, %37 : vector<2x10xf32>
    %cst_29 = arith.constant 1.000000e+00 : f32
    %40 = vector.broadcast %cst_29 : f32 to vector<2x10xf32>
    %41 = arith.divf %40, %39 : vector<2x10xf32>
    %cst_30 = arith.constant dense<0xFF800000> : vector<2xf32>
    %42 = vector.multi_reduction <maximumf>, %41, %cst_30 [1] : vector<2x10xf32> to vector<2xf32>
    %43 = vector.shape_cast %42 : vector<2xf32> to vector<2x1xf32>
    %44 = vector.broadcast %43 : vector<2x1xf32> to vector<2x10xf32>
    %45 = arith.subf %41, %44 : vector<2x10xf32>
    %46 = math.exp %45 : vector<2x10xf32>
    %cst_31 = arith.constant dense<0.000000e+00> : vector<2xf32>
    %47 = vector.multi_reduction <add>, %46, %cst_31 [1] : vector<2x10xf32> to vector<2xf32>
    %48 = vector.shape_cast %47 : vector<2xf32> to vector<2x1xf32>
    %49 = tpu.reciprocal %48 : vector<2x1xf32> -> vector<2x1xf32>
    %50 = vector.broadcast %49 : vector<2x1xf32> to vector<2x10xf32>
    %51 = arith.mulf %46, %50 : vector<2x10xf32>
    %cst_32 = arith.constant 0.000000e+00 : f32
    %52 = vector.broadcast %cst_32 : f32 to vector<2x2xf32>
    %53 = tpu.concatenate %51, %16, %17, %52 in 1 : vector<2x10xf32>, vector<2x10xf32>, vector<2x10xf32>, vector<2x2xf32> -> vector<2x32xf32>
    %c0_33 = arith.constant 0 : index
    %c0_34 = arith.constant 0 : index
    %54 = vector.load %arg12[%c0_33, %c0_34] : memref<2x32xf32, #tpu.memory_space<vmem>>, vector<2x32xf32>
    tpu.vector_store %arg12[%c0_33, %c0_34], %53 {strides = array<i32>} : memref<2x32xf32, #tpu.memory_space<vmem>>, vector<2x32xf32>,
    return
  }
  func.func @transform_0(%arg0: i32) -> (i32, i32) {
    %c0_i32 = arith.constant 0 : i32
    %c0_i32_0 = arith.constant 0 : i32
    return %arg0, %c0_i32 : i32, i32
  }
  func.func @transform_1(%arg0: i32) -> (i32, i32) {
    %c0_i32 = arith.constant 0 : i32
    %c0_i32_0 = arith.constant 0 : i32
    return %arg0, %c0_i32 : i32, i32
  }
  func.func @transform_2(%arg0: i32) -> (i32, i32) {
    %c0_i32 = arith.constant 0 : i32
    %c0_i32_0 = arith.constant 0 : i32
    %c0_i32_1 = arith.constant 0 : i32
    return %c0_i32, %c0_i32_0 : i32, i32
  }
  func.func @transform_3(%arg0: i32) -> (i32, i32) {
    %c0_i32 = arith.constant 0 : i32
    %c0_i32_0 = arith.constant 0 : i32
    %c0_i32_1 = arith.constant 0 : i32
    return %c0_i32, %c0_i32_0 : i32, i32
  }
  func.func @transform_4(%arg0: i32) -> (i32, i32) {
    %c0_i32 = arith.constant 0 : i32
    %c0_i32_0 = arith.constant 0 : i32
    %c0_i32_1 = arith.constant 0 : i32
    return %c0_i32, %c0_i32_0 : i32, i32
  }
  func.func @transform_5(%arg0: i32) -> (i32, i32) {
    %c0_i32 = arith.constant 0 : i32
    %c0_i32_0 = arith.constant 0 : i32
    %c0_i32_1 = arith.constant 0 : i32
    return %c0_i32, %c0_i32_0 : i32, i32
  }
  func.func @transform_6(%arg0: i32) -> (i32, i32) {
    %c0_i32 = arith.constant 0 : i32
    %c0_i32_0 = arith.constant 0 : i32
    %c0_i32_1 = arith.constant 0 : i32
    return %c0_i32, %c0_i32_0 : i32, i32
  }
  func.func @transform_7(%arg0: i32) -> (i32, i32) {
    %c0_i32 = arith.constant 0 : i32
    %c0_i32_0 = arith.constant 0 : i32
    %c0_i32_1 = arith.constant 0 : i32
    return %c0_i32, %c0_i32_0 : i32, i32
  }
  func.func @transform_8(%arg0: i32) -> (i32, i32) {
    %c0_i32 = arith.constant 0 : i32
    %c0_i32_0 = arith.constant 0 : i32
    %c0_i32_1 = arith.constant 0 : i32
    return %c0_i32, %c0_i32_0 : i32, i32
  }
  func.func @transform_9(%arg0: i32) -> (i32, i32) {
    %c0_i32 = arith.constant 0 : i32
    %c0_i32_0 = arith.constant 0 : i32
    %c0_i32_1 = arith.constant 0 : i32
    return %c0_i32, %c0_i32_0 : i32, i32
  }
  func.func @transform_10(%arg0: i32) -> (i32, i32) {
    %c0_i32 = arith.constant 0 : i32
    %c0_i32_0 = arith.constant 0 : i32
    %c0_i32_1 = arith.constant 0 : i32
    return %c0_i32, %c0_i32_0 : i32, i32
  }
  func.func @transform_11(%arg0: i32) -> (i32, i32) {
    %c0_i32 = arith.constant 0 : i32
    %c0_i32_0 = arith.constant 0 : i32
    return %arg0, %c0_i32 : i32, i32
  }
}

</mosaic_0001>

<bundles_post_ra>
// kernel: cvae_forward.1
= control target key start
LH: loop header
LB: loop body
LE: loop exit
PB: predicated region body
PF: predicated region fallthrough
CT: control target
= control target key end

     0   :  { %vm54_vm0 = vcmask 1041408   ;;  %v1154_v0 = vmov 0.0|0.0   ;;  %vm1155_vm1 = vmmov 1   ;;  %vm1156_vm3 = vmmov 0   ;;  %s1632_s2 = inlined_call_operand.vmem [shape: f32[10,20], index: 2, kind: input, shape index: {}]   ;;  %s1633_s4 = inlined_call_operand.vmem [shape: f32[20,20], index: 4, kind: input, shape index: {}]   ;;  %s1634_s0 = inlined_call_operand.vmem [shape: f32[2,32], index: 0, kind: input, shape index: {}]   ;;  %s1635_s3 = inlined_call_operand.vmem [shape: f32[1,20], index: 3, kind: input, shape index: {}]   ;;  %s1636_s7 = inlined_call_operand.vmem [shape: f32[784,20], index: 7, kind: input, shape index: {}]   ;;  %s1637_s1 = inlined_call_operand.vmem [shape: f32[2,784], index: 1, kind: input, shape index: {}]   ;;  %s1638_s6 = inlined_call_operand.vmem [shape: f32[10,20], index: 6, kind: input, shape index: {}]   ;;  %s1639_s5 = inlined_call_operand.vmem [shape: f32[1,20], index: 5, kind: input, shape index: {}]   ;;  %s1640_s9 = inlined_call_operand.vmem [shape: f32[20,10], index: 9, kind: input, shape index: {}]   ;;  %s1641_s8 = inlined_call_operand.vmem [shape: f32[1,20], index: 8, kind: input, shape index: {}]   ;;  %s1642_s10 = inlined_call_operand.vmem [shape: f32[1,10], index: 10, kind: input, shape index: {}]   ;;  %s1643_s11 = inlined_call_operand.vmem [shape: f32[2,32], index: 11, kind: output, shape index: {}]  }
   0x1   :  { %1024 = vmatprep.subr.bf16.mxu1 %v1154_v0  ;;  %v41_v1 = vld [vmem:[%s1632_s2] sm:$0xff]  ;;  %v42_v2 = vld [vmem:[%s1632_s2 + $0x8] sm:$0x3]  ;;  %vm1228_vm2 = vmpackc.low %vm54_vm0, %vm1155_vm1  ;;  %v1157_v5 = vmov 0.0   ;;  %vm50_vm4 = vcmask 80896   ;;  %vm143_vm5 = vcmask 1043456   ;;  %v329_v25 = vlaneseq }
   0x2   :  { %v1025_v4 = vpack.c.bf16 %v42_v2, %v41_v1  ;;  %989 = vmatprep.mubr.msk.f32.mxu1 %vm1156_vm3, %v1157_v5  ;;  %v129_v6 = vld [vmem:[%s1633_s4] sm:$0xff]  ;;  %v130_v7 = vld [vmem:[%s1633_s4 + $0x8] sm:$0xff]  ;;  %v131_v10 = vld [vmem:[%s1633_s4 + $0x10] sm:$0xf]  ;;  %vm139_vm6 = vcmask 162816   ;;  %vm364_vm7 = vcmask 130048  }
   0x3   :  { %v1245_v8 = vld [vmem:[%s1634_s0] sm:$0x3]  ;;  %v1029_v9 = vpack.c.bf16 %v130_v7, %v129_v6  ;;  %v242_v17 = vld [vmem:[%s1636_s7 + $0x88] sm:$0xff]  ;;  %v243_v21 = vld [vmem:[%s1636_s7 + $0x90] sm:$0xff]  ;;  %v1158_v23 = vmov 1983009808  }
   0x4   :  { %1027 = vmatpush3.bf16.msk.msra.mxu1 %vm1228_vm2, %v1025_v4  ;;  %v850_v11 = vld [vmem:[%s1635_s3] ss:$0 sm:$0xff]  ;;  %v226_v20 = vld [vmem:[%s1636_s7 + $0x8] sm:$0xff]  ;;  %v244_v22 = vld [vmem:[%s1636_s7 + $0x98] sm:$0xff]  ;;  %v327_v24 = vunpack.c.l.s4 %v1158_v23  ;;  %v330_v37 = vshrl.u32 %v329_v25, 7  ;;  %s1159_s2 = smov 118  }
   0x5   :  { %1028 = vmatprep.subr.bf16.mxu1 %v1154_v0  ;;  %v241_v16 = vld [vmem:[%s1636_s7 + $0x80] sm:$0xff]  ;;  %v1035_v27 = vpack.c.bf16 %v244_v22, %v243_v21  ;;  %v227_v28 = vld [vmem:[%s1636_s7 + $0x10] sm:$0xff]  ;;  %v228_v29 = vld [vmem:[%s1636_s7 + $0x18] sm:$0xff]  ;;  %vm824_vm8 = vcmask 74752   ;;  %vm842_vm9 = vcmask 244736   ;;  %vm844_vm10 = vcmask 254976  }
   0x6   :  { %v225_v18 = vld [vmem:[%s1636_s7] sm:$0xff]  ;;  %v1031_v19 = vpack.c.bf16 %v242_v17, %v241_v16  ;;  %v246_v31 = vld [vmem:[%s1636_s7 + $0xa8] sm:$0xff]  ;;  %v1037_v32 = vpack.c.bf16 %v228_v29, %v227_v28  ;;  %v328_v36 = vunpack.c.0.s8 %v327_v24  ;;  %v247_v38 = vld [vmem:[%s1636_s7 + $0xb0] sm:$0xff] }
   0x7   :  { %990 = vmatmul.mubr.msk.f32.vlgmr.msra.gmra.mrb[0].mxu1 %vm50_vm4, %v1245_v8  ;;  %v1033_v26 = vpack.c.bf16 %v226_v20, %v225_v18  ;;  %v245_v30 = vld [vmem:[%s1636_s7 + $0xa0] sm:$0xff]  ;;  %v230_v35 = vld [vmem:[%s1636_s7 + $0x28] sm:$0xff]  ;;  %v248_v39 = vld [vmem:[%s1636_s7 + $0xb8] sm:$0xff] }
   0x8   :  { %1030 = vmatpush3.bf16.msra.mxu1 %v1029_v9  ;;  %998 = vmatprep.mubr.msk.f32.mxu1 %vm1156_vm3, %v1157_v5  ;;  %v1039_v33 = vpack.c.bf16 %v246_v31, %v245_v30  ;;  %v229_v34 = vld [vmem:[%s1636_s7 + $0x20] sm:$0xff]  ;;  %v1043_v41 = vpack.c.bf16 %v248_v39, %v247_v38  ;;  %v231_v42 = vld [vmem:[%s1636_s7 + $0x30] sm:$0xff]  ;;  %v232_v43 = vld [vmem:[%s1636_s7 + $0x38] sm:$0xff]  ;;  %v1309_v44 = vsub.s32 %v328_v36, %v330_v37 }
   0x9   :  { %996 = vmatprep.subr.mxu1 %v1157_v5  ;;  %1032 = vmatprep.subr.bf16.mxu0 %v1031_v19  ;;  %v1041_v40 = vpack.c.bf16 %v230_v35, %v229_v34  ;;  %v249_v45 = vld [vmem:[%s1636_s7 + $0xc0] sm:$0xff]  ;;  %v250_v46 = vld [vmem:[%s1636_s7 + $0xc8] sm:$0xff]  ;;  %v1045_v51 = vpack.c.bf16 %v232_v43, %v231_v42  ;;  %v251_v58 = vld [vmem:[%s1636_s7 + $0xd0] sm:$0xff] }
   0xa   :  { %1034 = vmatpush3.bf16.msra.mxu0 %v1033_v26  ;;  %v273_v47 = vld [vmem:[%s1636_s7 + $0x180] sm:$0xff]  ;;  %v274_v48 = vld [vmem:[%s1636_s7 + $0x188] sm:$0xff]  ;;  %v1047_v56 = vpack.c.bf16 %v250_v46, %v249_v45  ;;  %v252_v59 = vld [vmem:[%s1636_s7 + $0xd8] sm:$0xff] }
   0xb   :  { %1036 = vmatprep.subr.bf16.mxu0 %v1035_v27  ;;  %v257_v49 = vld [vmem:[%s1636_s7 + $0x100] sm:$0xff]  ;;  %v258_v50 = vld [vmem:[%s1636_s7 + $0x108] sm:$0xff]  ;;  %v1063_v53 = vpack.c.bf16 %v274_v48, %v273_v47  ;;  %v275_v62 = vld [vmem:[%s1636_s7 + $0x190] sm:$0xff] }
   0xc   :  { %997 = vmatpush3.msk.msra.mxu1 %vm143_vm5, %v131_v10  ;;  %v233_v52 = vld [vmem:[%s1636_s7 + $0x40] sm:$0xff]  ;;  %v1065_v54 = vpack.c.bf16 %v258_v50, %v257_v49  ;;  %v234_v57 = vld [vmem:[%s1636_s7 + $0x48] sm:$0xff]  ;;  %v276_v63 = vld [vmem:[%s1636_s7 + $0x198] sm:$0xff] }
   0xd   :  { %v39_v55 = vld [vmem:[%s1637_s1] sm:$0xff]  ;;  %1064 = vmatprep.subr.bf16.mxu1 %v1063_v53  ;;  %v259_v1 = vld [vmem:[%s1636_s7 + $0x110] sm:$0xff]  ;;  %v1067_v4 = vpack.c.bf16 %v276_v63, %v275_v62  ;;  %v260_v6 = vld [vmem:[%s1636_s7 + $0x118] sm:$0xff]  ;;  %v1049_v9 = vpack.c.bf16 %v234_v57, %v233_v52 }
   0xe   :  { %1038 = vmatpush3.bf16.msra.mxu0 %v1037_v32  ;;  %v325_v60 = vcombine.high %v39_v55, %v39_v55  ;;  %v1345_v61 = vrot.slane %v39_v55, %v1309_v44  ;;  %v235_v10 = vld [vmem:[%s1636_s7 + $0x50] sm:$0xff]  ;;  %v261_v16 = vld [vmem:[%s1636_s7 + $0x120] sm:$0xff]  ;;  %v262_v17 = vld [vmem:[%s1636_s7 + $0x128] sm:$0xff] }
   0xf   :  { %1040 = vmatprep.subr.bf16.mxu0 %v1039_v33  ;;  %v253_v19 = vld [vmem:[%s1636_s7 + $0xe0] sm:$0xff]  ;;  %v254_v20 = vld [vmem:[%s1636_s7 + $0xe8] sm:$0xff]  ;;  %v1073_v22 = vpack.c.bf16 %v262_v17, %v261_v16  ;;  %v279_v23 = vld [vmem:[%s1636_s7 + $0x1b0] sm:$0xff] }
  0x10   :  { %v340_v2 = vcombine.high %v1345_v61, %v1345_v61  ;;  %v1362_v7 = vrot.slane %v325_v60, %v1309_v44  ;;  %v280_v24 = vld [vmem:[%s1636_s7 + $0x1b8] sm:$0xff]  ;;  %v263_v27 = vld [vmem:[%s1636_s7 + $0x130] sm:$0xff]  ;;  %v1055_v29 = vpack.c.bf16 %v254_v20, %v253_v19  ;;  %v237_v30 = vld [vmem:[%s1636_s7 + $0x60] sm:$0xff] }
  0x11   :  { %v1075_v26 = vpack.c.bf16 %v280_v24, %v279_v23  ;;  %v264_v28 = vld [vmem:[%s1636_s7 + $0x138] sm:$0xff]  ;;  %v238_v31 = vld [vmem:[%s1636_s7 + $0x68] sm:$0xff]  ;;  %v255_v32 = vld [vmem:[%s1636_s7 + $0xf0] sm:$0xff] }
  0x12   :  { %1042 = vmatpush3.bf16.msra.mxu0 %v1041_v40  ;;  %431 = vmatprep.mubr.f32.mxu0 %v340_v2  ;;  %v341_v18 = vcombine.high %v1362_v7, %v1362_v7  ;;  %v256_v33 = vld [vmem:[%s1636_s7 + $0xf8] sm:$0xff]  ;;  %v281_v34 = vld [vmem:[%s1636_s7 + $0x1c0] sm:$0xff]  ;;  %v282_v35 = vld [vmem:[%s1636_s7 + $0x1c8] sm:$0xff]  ;;  %v1077_v36 = vpack.c.bf16 %v264_v28, %v263_v27  ;;  %v1057_v37 = vpack.c.bf16 %v238_v31, %v237_v30 }
  0x13   :  { %1044 = vmatprep.subr.bf16.mxu0 %v1043_v41  ;;  %v239_v38 = vld [vmem:[%s1636_s7 + $0x70] sm:$0xff]  ;;  %v1079_v39 = vpack.c.bf16 %v282_v35, %v281_v34  ;;  %v265_v40 = vld [vmem:[%s1636_s7 + $0x140] sm:$0xff]  ;;  %v266_v41 = vld [vmem:[%s1636_s7 + $0x148] sm:$0xff]  ;;  %v1059_v42 = vpack.c.bf16 %v256_v33, %v255_v32 }
  0x14   :  { %v240_v43 = vld [vmem:[%s1636_s7 + $0x78] sm:$0xff]  ;;  %v283_v45 = vld [vmem:[%s1636_s7 + $0x1d0] sm:$0xff]  ;;  %v1441_v47 = vld [vmem:[%s1637_s1 + $0x8] sm:$0x3f]  ;;  %v1081_v50 = vpack.c.bf16 %v266_v41, %v265_v40 }
  0x15   :  { %v284_v46 = vld [vmem:[%s1636_s7 + $0x1d8] sm:$0xff]  ;;  %v305_v48 = vld [vmem:[%s1636_s7 + $0x280] sm:$0xff]  ;;  %v306_v49 = vld [vmem:[%s1636_s7 + $0x288] sm:$0xff]  ;;  %v1469_v60 = vrot.slane %v1441_v47, %v1309_v44  ;;  %v342_v34 = vcombine.high %v1441_v47, %v1441_v47 }
  0x16   :  { %1046 = vmatpush3.bf16.msra.mxu0 %v1045_v51  ;;  %v1061_v51 = vpack.c.bf16 %v240_v43, %v239_v38  ;;  %v289_v52 = vld [vmem:[%s1636_s7 + $0x200] sm:$0xff]  ;;  %v1083_v53 = vpack.c.bf16 %v284_v46, %v283_v45  ;;  %v268_v55 = vld [vmem:[%s1636_s7 + $0x158] sm:$0xff]  ;;  %v290_v57 = vld [vmem:[%s1636_s7 + $0x208] sm:$0xff] }
  0x17   :  { %1048 = vmatprep.subr.bf16.mxu0 %v1047_v56  ;;  %v1095_v56 = vpack.c.bf16 %v306_v49, %v305_v48  ;;  %v307_v62 = vld [vmem:[%s1636_s7 + $0x290] sm:$0xff]  ;;  %v308_v63 = vld [vmem:[%s1636_s7 + $0x298] sm:$0xff]  ;;  %v1097_v2 = vpack.c.bf16 %v290_v57, %v289_v52  ;;  %v309_v16 = vld [vmem:[%s1636_s7 + $0x2a0] sm:$0xff]  ;;  %v356_v45 = vrot.slane %v342_v34, %v1309_v44 }
  0x18   :  { %v310_v17 = vld [vmem:[%s1636_s7 + $0x2a8] sm:$0xff]  ;;  %v295_v32 = vld [vmem:[%s1636_s7 + $0x230] sm:$0xff]  ;;  %v296_v33 = vld [vmem:[%s1636_s7 + $0x238] sm:$0xff] }
  0x19   :  { %v1103_v23 = vpack.c.bf16 %v310_v17, %v309_v16  ;;  %v294_v24 = vld [vmem:[%s1636_s7 + $0x228] sm:$0xff]  ;;  %v313_v35 = vld [vmem:[%s1636_s7 + $0x2c0] sm:$0xff]  ;;  %v1109_v38 = vpack.c.bf16 %v296_v33, %v295_v32  ;;  %v315_v46 = vld [vmem:[%s1636_s7 + $0x2d0] sm:$0xff] }
  0x1a   :  { %1050 = vmatpush3.bf16.msra.mxu0 %v1049_v9  ;;  %v269_v9 = vld [vmem:[%s1636_s7 + $0x160] sm:$0xff]  ;;  %v322_v30 = vld [vmem:[%s1636_s7 + $0x308] sm:$0xff]  ;;  %v316_v47 = vld [vmem:[%s1636_s7 + $0x2d8] sm:$0xff] }
  0x1b   :  { %v224_v40 = vld [vmem:[%s1638_s6 + $0x8] sm:$0x3]  ;;  %v1115_v44 = vpack.c.bf16 %v316_v47, %v315_v46  ;;  %v319_v3 = vld [vmem:[%s1636_s7 + $0x2f0] sm:$0xff]  ;;  %v320_v57 = vld [vmem:[%s1636_s7 + $0x2f8] sm:$0xff] }
  0x1c   :  { %v298_v43 = vld [vmem:[%s1636_s7 + $0x248] sm:$0xff] }
  0x1d   :  { %v318_v52 = vld [vmem:[%s1636_s7 + $0x2e8] sm:$0xff] }
  0xda   :  { %v124_v12 = vpop.f32.mrb[0].mxu1 }
  0xdb   :  { %v125_v13 = vadd.f32 %v850_v11, %v124_v12  ;;  %v991_v14 = vpop.f32.mrb[1].mxu1  ;;  %v236_v11 = vld [vmem:[%s1636_s7 + $0x58] sm:$0xff]  ;;  %v1069_v12 = vpack.c.bf16 %v260_v6, %v259_v1 }
  0xdc   :  { %v1051_v14 = vpack.c.bf16 %v252_v59, %v251_v58  ;;  %v1053_v25 = vpack.c.bf16 %v236_v11, %v235_v10  ;;  %v285_v58 = vld [vmem:[%s1636_s7 + $0x1e0] sm:$0xff]  ;;  %v286_v59 = vld [vmem:[%s1636_s7 + $0x1e8] sm:$0xff]  ;;  %v1099_v11 = vpack.c.bf16 %v308_v63, %v307_v62  ;;  %v304_v62 = vld [vmem:[%s1636_s7 + $0x278] sm:$0xff] }
  0xdd   :  { %v128_v15 = vmax.f32 %v125_v13, 0.0  ;;  %v277_v13 = vld [vmem:[%s1636_s7 + $0x1a0] sm:$0xff]  ;;  %v1087_v6 = vpack.c.bf16 %v286_v59, %v285_v58  ;;  %v270_v10 = vld [vmem:[%s1636_s7 + $0x168] sm:$0xff]  ;;  %v1123_v58 = vpack.c.bf16 %v320_v57, %v319_v3  ;;  %v303_v59 = vld [vmem:[%s1636_s7 + $0x270] sm:$0xff] }
  0xde   :  { %1052 = vmatprep.subr.bf16.mxu0 %v1051_v14  ;;  %v288_v14 = vld [vmem:[%s1636_s7 + $0x1f8] sm:$0xff]  ;;  %v1125_v63 = vpack.c.bf16 %v304_v62, %v303_v59 }
  0xdf   :  { %999 = vmatmul.mubr.msk.f32.vlgmr.msra.gmra.mrb[2].mxu1 %vm139_vm6, %v128_v15  ;;  %v278_v15 = vld [vmem:[%s1636_s7 + $0x1a8] sm:$0xff]  ;;  %1054 = vmatpush3.bf16.msra.mxu0 %v1053_v25  ;;  %v311_v25 = vld [vmem:[%s1636_s7 + $0x2b0] sm:$0xff] }
  0xe0   :  { %1066 = vmatpush3.bf16.msra.mxu1 %v1065_v54  ;;  %v1071_v21 = vpack.c.bf16 %v278_v15, %v277_v13  ;;  %501 = vmatprep.mubr.f32.mxu1 %v341_v18  ;;  %v267_v54 = vld [vmem:[%s1636_s7 + $0x150] sm:$0xff]  ;;  %v357_v15 = vcombine.high %v1469_v60, %v1469_v60  ;;  %v1089_v18 = vpack.c.bf16 %v270_v10, %v269_v9 }
  0xe1   :  { %1068 = vmatprep.subr.bf16.mxu1 %v1067_v4  ;;  %1056 = vmatprep.subr.bf16.mxu0 %v1055_v29  ;;  %v1085_v1 = vpack.c.bf16 %v268_v55, %v267_v54  ;;  %v291_v4 = vld [vmem:[%s1636_s7 + $0x210] sm:$0xff]  ;;  %v321_v29 = vld [vmem:[%s1636_s7 + $0x300] sm:$0xff] }
  0xe2   :  { %v287_v13 = vld [vmem:[%s1636_s7 + $0x1f0] sm:$0xff]  ;;  %v301_v55 = vld [vmem:[%s1636_s7 + $0x260] sm:$0xff] }
  0xe3   :  { %1058 = vmatpush3.bf16.msra.mxu0 %v1057_v37  ;;  %v1091_v20 = vpack.c.bf16 %v288_v14, %v287_v13  ;;  %v1128_v37 = vpack.c.bf16 %v322_v30, %v321_v29 }
  0xe4   :  { %1070 = vmatpush3.bf16.msra.mxu1 %v1069_v12  ;;  %1060 = vmatprep.subr.bf16.mxu0 %v1059_v42  ;;  %v292_v12 = vld [vmem:[%s1636_s7 + $0x218] sm:$0xff]  ;;  %v297_v42 = vld [vmem:[%s1636_s7 + $0x240] sm:$0xff] }
  0xe5   :  { %1072 = vmatprep.subr.bf16.mxu1 %v1071_v21  ;;  %v1101_v19 = vpack.c.bf16 %v292_v12, %v291_v4  ;;  %v271_v21 = vld [vmem:[%s1636_s7 + $0x170] sm:$0xff]  ;;  %v1113_v49 = vpack.c.bf16 %v298_v43, %v297_v42 }
  0xe7   :  { %1062 = vmatpush3.bf16.msra.mxu0 %v1061_v51  ;;  %v317_v51 = vld [vmem:[%s1636_s7 + $0x2e0] sm:$0xff] }
  0xe8   :  { %1074 = vmatpush3.bf16.msra.mxu1 %v1073_v22  ;;  %1096 = vmatprep.subr.bf16.mxu0 %v1095_v56  ;;  %v272_v22 = vld [vmem:[%s1636_s7 + $0x178] sm:$0xff]  ;;  %v1119_v54 = vpack.c.bf16 %v318_v52, %v317_v51  ;;  %v302_v56 = vld [vmem:[%s1636_s7 + $0x268] sm:$0xff] }
  0xe9   :  { %1076 = vmatprep.subr.bf16.mxu1 %v1075_v26  ;;  %v312_v26 = vld [vmem:[%s1636_s7 + $0x2b8] sm:$0xff]  ;;  %v1093_v27 = vpack.c.bf16 %v272_v22, %v271_v21 }
  0xea   :  { %432 = vmatmul.mubr.f32.vlgmr.msra.gmra.mrb[0].mxu0 %v1345_v61  ;;  %v293_v61 = vld [vmem:[%s1636_s7 + $0x220] sm:$0xff]  ;;  %v1107_v31 = vpack.c.bf16 %v312_v26, %v311_v25  ;;  %v734_v26 = vld [vmem:[%s1640_s9 + $0x10] sm:$0xf] }
  0xeb   :  { %1098 = vmatpush3.bf16.msra.mxu0 %v1097_v2  ;;  %571 = vmatprep.mubr.f32.mxu0 %v357_v15  ;;  %v1105_v28 = vpack.c.bf16 %v294_v24, %v293_v61  ;;  %v732_v61 = vld [vmem:[%s1640_s9] sm:$0xff]  ;;  %v733_v24 = vld [vmem:[%s1640_s9 + $0x8] sm:$0xff] }
  0xec   :  { %1078 = vmatpush3.bf16.msra.mxu1 %v1077_v36  ;;  %1100 = vmatprep.subr.bf16.mxu0 %v1099_v11  ;;  %v314_v36 = vld [vmem:[%s1636_s7 + $0x2c8] sm:$0xff]  ;;  %v1135_v25 = vpack.c.bf16 %v733_v24, %v732_v61 }
  0xed   :  { %1080 = vmatprep.subr.bf16.mxu1 %v1079_v39  ;;  %v223_v39 = vld [vmem:[%s1638_s6] sm:$0xff]  ;;  %v1111_v41 = vpack.c.bf16 %v314_v36, %v313_v35 }
  0xee   :  { %v1131_v48 = vpack.c.bf16 %v224_v40, %v223_v39 }
  0xef   :  { %1102 = vmatpush3.bf16.msra.mxu0 %v1101_v19 }
  0xf0   :  { %1082 = vmatpush3.bf16.msra.mxu1 %v1081_v50  ;;  %1104 = vmatprep.subr.bf16.mxu0 %v1103_v23  ;;  %v299_v50 = vld [vmem:[%s1636_s7 + $0x250] sm:$0xff] }
  0xf1   :  { %1084 = vmatprep.subr.bf16.mxu1 %v1083_v53 }
  0xf3   :  { %1106 = vmatpush3.bf16.msra.mxu0 %v1105_v28  ;;  %v859_v28 = vld [vmem:[%s1641_s8] ss:$0 sm:$0xff]  ;;  %s1160_s8 = smov 10  }
  0xf4   :  { %1086 = vmatpush3.bf16.msra.mxu1 %v1085_v1  ;;  %1108 = vmatprep.subr.bf16.mxu0 %v1107_v31  ;;  %v853_v1 = vld [vmem:[%s1639_s5] ss:$0 sm:$0xff] }
  0xf5   :  { %1088 = vmatprep.subr.bf16.mxu1 %v1087_v6 }
  0xf7   :  { %1110 = vmatpush3.bf16.msra.mxu0 %v1109_v38 }
  0xf8   :  { %1090 = vmatpush3.bf16.msra.mxu1 %v1089_v18  ;;  %1112 = vmatprep.subr.bf16.mxu0 %v1111_v41 }
  0xf9   :  { %1092 = vmatprep.subr.bf16.mxu1 %v1091_v20 }
  0xfb   :  { %1114 = vmatpush3.bf16.msra.mxu0 %v1113_v49 }
  0xfc   :  { %1094 = vmatpush3.bf16.msra.mxu1 %v1093_v27  ;;  %1116 = vmatprep.subr.bf16.mxu0 %v1115_v44 }
  0xfd   :  { %1127 = vmatprep.subr.bf16.mxu1 %v1154_v0 }
  0xff   :  { %502 = vmatmul.mubr.f32.vlgmr.msra.gmra.mrb[4].mxu1 %v1362_v7  ;;  %v300_v7 = vld [vmem:[%s1636_s7 + $0x258] sm:$0xff] }
 0x100   :  { %1129 = vmatpush3.bf16.msra.mxu1 %v1128_v37  ;;  %1005 = vmatprep.mubr.msk.f32.mxu1 %vm1156_vm3, %v1157_v5  ;;  %v1117_v53 = vpack.c.bf16 %v300_v7, %v299_v50 }
 0x101   :  { %1130 = vmatprep.subr.bf16.mxu1 %v1154_v0 }
 0x102   :  { %1118 = vmatpush3.bf16.msra.mxu0 %v1117_v53 }
 0x103   :  { %1006 = vmatmul.mubr.msk.f32.vlgmr.msra.gmra.mrb[6].mxu1 %vm364_vm7, %v356_v45  ;;  %1120 = vmatprep.subr.bf16.mxu0 %v1119_v54 }
 0x104   :  { %1133 = vmatpush3.bf16.msk.msra.mxu1 %vm1228_vm2, %v1131_v48  ;;  %1012 = vmatprep.mubr.msk.f32.mxu1 %vm1156_vm3, %v1157_v5 }
 0x105   :  { %1134 = vmatprep.subr.bf16.mxu1 %v1154_v0  ;;  %v1121_v0 = vpack.c.bf16 %v302_v56, %v301_v55 }
 0x107   :  { %1122 = vmatpush3.bf16.msra.mxu0 %v1121_v0 }
 0x108   :  { %1124 = vmatprep.subr.bf16.mxu0 %v1123_v58 }
 0x10b   :  { %1126 = vmatpush3.bf16.msra.mxu0 %v1125_v63 }
 0x10e   :  { %572 = vmatmul.mubr.f32.vlgmr.msra.gmra.mrb[2].mxu0 %v1469_v60 }
 0x1b2   :  { %v213_v2 = vpop.f32.mrb[2].mxu1 }
 0x1b3   :  { %v214_v4 = vadd.f32 %v853_v1, %v213_v2  ;;  %v1000_v6 = vpop.f32.mrb[3].mxu1 }
 0x1b5   :  { %v217_v9 = vmul.f32 %v214_v4, %v1245_v8 }
 0x1b7   :  { %219 = vrot.lane.b32.xlu0 %v217_v9, %s1159_s2 }
 0x1bd   :  { %v902_v12 = vpop.f32.mrb[0].mxu0 }
 0x1be   :  { %v903_v60 = vpop.f32.mrb[1].mxu0 }
 0x1bf   :  { %v904_v13 = vadd.f32 %v903_v60, %v902_v12 }
 0x1d2   :  { %v937_v14 = vpop.f32.mrb[4].mxu1 }
 0x1d3   :  { %v938_v15 = vpop.f32.mrb[5].mxu1 }
 0x1d4   :  { %v939_v16 = vadd.f32 %v938_v15, %v937_v14 }
 0x1d6   :  { %v504_v17 = vadd.f32 %v939_v16, %v904_v13  ;;  %v643_v18 = vpop.f32.mrb[6].mxu1 }
 0x1d7   :  { %v1007_v19 = vpop.f32.mrb[7].mxu1 }
 0x1e1   :  { %v972_v20 = vpop.f32.mrb[2].mxu0 }
 0x1e2   :  { %v973_v8 = vpop.f32.mrb[3].mxu0 }
 0x1e3   :  { %v974_v21 = vadd.f32 %v973_v8, %v972_v20 }
 0x1e5   :  { %v574_v22 = vadd.f32 %v974_v21, %v504_v17 }
 0x1e7   :  { %v644_v23 = vadd.f32 %v643_v18, %v574_v22 }
 0x229   :  { %v220_v10 = vpop.permute.xlu0 %219 }
 0x22a   :  { %v222_v11 = vadd.f32 %v220_v10, %v214_v4 }
 0x22c   :  { %1013 = vmatmul.mubr.msk.f32.vlgmr.msra.gmra.mrb[8].mxu1 %vm50_vm4, %v222_v11 }
 0x22d   :  { %1021 = vmatprep.mubr.msk.f32.mxu1 %vm1156_vm3, %v1157_v5  ;;  %1136 = vmatpush3.bf16.msra.mxu1 %v1135_v25 }
 0x22e   :  { %1019 = vmatprep.subr.mxu1 %v1157_v5  ;;  %v860_v5 = vld [vmem:[%s1642_s10] ss:$0 sm:$0xff] }
 0x231   :  { %1020 = vmatpush3.msk.msra.mxu1 %vm143_vm5, %v734_v26 }
 0x2ff   :  { %v719_v27 = vpop.f32.mrb[8].mxu1 }
 0x300   :  { %v720_v29 = vadd.f32 %v719_v27, %v644_v23  ;;  %v1014_v30 = vpop.f32.mrb[9].mxu1 }
 0x302   :  { %v730_v31 = vadd.f32 %v859_v28, %v720_v29 }
 0x304   :  { %v731_v32 = vmax.f32 %v730_v31, 0.0 }
 0x306   :  { %1022 = vmatmul.mubr.msk.f32.vlgmr.msra.gmra.mrb[10].mxu1 %vm139_vm6, %v731_v32 }
 0x3d9   :  { %v814_v33 = vpop.f32.mrb[10].mxu1 }
 0x3da   :  { %v815_v34 = vadd.f32 %v860_v5, %v814_v33  ;;  %v1023_v35 = vpop.f32.mrb[11].mxu1 }
 0x3dc   :  { %v818_v36 = vsub.f32 0.0, %v815_v34 }
 0x3de   :  { %v819_v37 = vmul.f32 1.442695, %v818_v36 }
 0x3e0   :  { %1146 = vpow2.f32 %v819_v37 }
 0x3ea   :  { %v1147_v38 = vpop.eup %1146 }
 0x3eb   :  { %v821_v39 = vadd.f32 1.0, %v1147_v38 }
 0x3ed   :  { %1148 = vrcp.f32 %v821_v39 }
 0x3f7   :  { %v1149_v40 = vpop.eup %1148 }
 0x3f8   :  { %v825_v41 = vsel %vm824_vm8, %v1149_v40, -inf }
 0x3f9   :  { %826 = vmax.xlane.f32.xlu0 %v825_v41 }
 0x486   :  { %v827_v42 = vpop.xlane.xlu0 %826 }
 0x487   :  { %v828_v43 = vsub.f32 %v1149_v40, %v827_v42 }
 0x489   :  { %v829_v45 = vmul.f32 1.442695, %v828_v43 }
 0x48b   :  { %1150 = vpow2.f32 %v829_v45 }
 0x495   :  { %v1151_v46 = vpop.eup %1150 }
 0x496   :  { %v831_v47 = vsel %vm824_vm8, %v1151_v46, 0.0 }
 0x497   :  { %832 = vadd.xlane.f32.xlu1 %v831_v47 }
 0x4a8   :  { %837 = vrot.lane.b32.xlu1 %v214_v4, %s1160_s8 }
 0x524   :  { %v833_v48 = vpop.xlane.xlu1 %832 }
 0x525   :  { %1152 = vrcp.f32 %v833_v48 }
 0x528   :  { %v838_v50 = vpop.permute.xlu1 %837 }
 0x52f   :  { %v1153_v49 = vpop.eup %1152 }
 0x530   :  { %v835_v44 = vmul.f32 %v1153_v49, %v1151_v46 }
 0x532   :  { %v840_v7 = vsel %vm50_vm4, %v835_v44, %v838_v50 }
 0x533   :  { %v841_v51 = vsel %vm139_vm6, %v840_v7, %v838_v50 }
 0x534   :  { %v843_v52 = vsel %vm842_vm9, %v841_v51, 0.0 }
 0x535   :  { %845 = vst.msk [vmem:[%s1643_s11] sm:$0x3] %vm844_vm10, %v843_v52 }

</bundles_post_ra>
